<compile_context>
chip_gen: v7x
topology: tpu7x:2x2x1
jax: 0.10.0
libtpu: 0.0.40
codegen_flags: <defaults>
</compile_context>

<pallas_src>
import jax
import jax.numpy as jnp
from jax.experimental import pallas as pl
from jax.experimental.pallas import tpu as pltpu


LANE_WIDTH = 512    # lane dim: multiple of 128 -> unmasked, lane-dense vld/vst
ROW_TILE = 1024     # sublane tile (multiple of 8); (1024, 512) f32 tile = 2 MiB


def copy_kernel(x_ref, o_ref):
    # Elementwise hot-path placeholder: copies the VMEM tile through the VPU.
    # A concrete MyModel subclass would replace this body with real math.
    o_ref[...] = x_ref[...]


@jax.jit
def my_model_forward(x):
    """Pallas 'forward' for MyModel (abstract base -> identity pass-through).

    Args:
      x: array of shape (B, C, H, W), any float dtype (NCHW, PyTorch layout).
    Returns:
      array identical to x (same shape, dtype).
    """
    orig_shape = x.shape
    dtype = x.dtype
    n = x.size  # static under jit

    # Flatten to a lane-dense 2-D slab (rows, LANE_WIDTH); pure reshape/pad,
    # no transpose, so the layout change is copy-free plumbing.
    ncols = LANE_WIDTH
    rows = -(-n // ncols)
    if rows > ROW_TILE:
        # Pad rows to a multiple of ROW_TILE so every grid block is full-sized.
        rows_p = -(-rows // ROW_TILE) * ROW_TILE
        tile_rows = ROW_TILE
    else:
        # Small input: a single block equal to the full array extent
        # (legal even if rows is not a multiple of 8).
        rows_p = rows
        tile_rows = rows

    pad = rows_p * ncols - n
    flat = x.reshape(-1)
    if pad:
        flat = jnp.pad(flat, (0, pad))
    slab = flat.reshape(rows_p, ncols)

    grid = (rows_p // tile_rows,)

    out = pl.pallas_call(
        copy_kernel,
        out_shape=jax.ShapeDtypeStruct((rows_p, ncols), dtype),
        grid=grid,
        in_specs=[pl.BlockSpec((tile_rows, ncols), lambda i: (i, 0))],
        out_specs=pl.BlockSpec((tile_rows, ncols), lambda i: (i, 0)),
        input_output_aliases={0: 0},  # output reuses the intermediate slab buffer
        compiler_params=pltpu.CompilerParams(
            dimension_semantics=("parallel",),  # shard row tiles across TCs (v7x)
        ),
    )(slab)

    return out.reshape(-1)[:n].reshape(orig_shape)


if __name__ == "__main__":
    key = jax.random.PRNGKey(0)
    # Small NCHW input consistent with an operator-learning model's field input.
    x = jax.random.normal(key, (2, 4, 16, 16), dtype=jnp.float32)

    y = my_model_forward(x)
    jax.block_until_ready(y)

    # Sanity check: identity semantics (the only defined behavior of the
    # abstract base module), same shape & dtype.
    assert y.shape == x.shape and y.dtype == x.dtype
    assert bool(jnp.allclose(y, x))

    print("KERNEL_OK")
</pallas_src>

<mosaic_0001>
module attributes {stable_mosaic.version = 11 : i64} {
  func.func @copy_kernel(%arg0: i32, %arg1: memref<4x512xf32, #tpu.memory_space<vmem>>, %arg2: memref<4x512xf32, #tpu.memory_space<vmem>>) attributes {dimension_semantics = [#tpu.dimension_semantics<parallel>], iteration_bounds = array<i64: 1>, scalar_prefetch = 0 : i64, scratch_operands = 0 : i64, tpu.core_type = #tpu.core_type<tc>, window_params = [{transform_indices = @transform_0, window_bounds = array<i64: 4, 512>}, {transform_indices = @transform_1, window_bounds = array<i64: 4, 512>}]} {
    %c0 = arith.constant 0 : index
    %c0_0 = arith.constant 0 : index
    %0 = vector.load %arg1[%c0, %c0_0] : memref<4x512xf32, #tpu.memory_space<vmem>>, vector<4x512xf32>
    %c0_1 = arith.constant 0 : index
    %c0_2 = arith.constant 0 : index
    %1 = vector.load %arg2[%c0_1, %c0_2] : memref<4x512xf32, #tpu.memory_space<vmem>>, vector<4x512xf32>
    tpu.vector_store %arg2[%c0_1, %c0_2], %0 {strides = array<i32>} : memref<4x512xf32, #tpu.memory_space<vmem>>, vector<4x512xf32>,
    return
  }
  func.func @transform_0(%arg0: i32) -> (i32, i32) {
    %c0_i32 = arith.constant 0 : i32
    %c0_i32_0 = arith.constant 0 : i32
    return %arg0, %c0_i32 : i32, i32
  }
  func.func @transform_1(%arg0: i32) -> (i32, i32) {
    %c0_i32 = arith.constant 0 : i32
    %c0_i32_0 = arith.constant 0 : i32
    return %arg0, %c0_i32 : i32, i32
  }
}

</mosaic_0001>

<bundles_post_ra>
// kernel: my_model_forward.1
= control target key start
LH: loop header
LB: loop body
LE: loop exit
PB: predicated region body
PF: predicated region fallthrough
CT: control target
= control target key end

     0   :  { %s38_s0 = inlined_call_operand.vmem [shape: f32[4,512], index: 0, kind: input, shape index: {}, may-alias: {0,1}]   ;;  %s39_s1 = inlined_call_operand.vmem [shape: f32[4,512], index: 1, kind: output, shape index: {}, may-alias: {0,1}]  }
   0x1   :  { %v8_v0 = vld [vmem:[%s38_s0] sm:$0xff]  ;;  %v9_v1 = vld [vmem:[%s38_s0 + $0x8] sm:$0xff] }
   0x2   :  { %10 = vst [vmem:[%s39_s1] sm:$0xff] %v8_v0  ;;  %11 = vst [vmem:[%s39_s1 + $0x8] sm:$0xff] %v9_v1 }

</bundles_post_ra>
